<compile_context>
chip_gen: v7x
topology: tpu7x:2x2x1
jax: 0.10.0
libtpu: 0.0.40
codegen_flags: <defaults>
</compile_context>

<pallas_src>
import functools
import math

import jax
import jax.numpy as jnp
from jax.experimental import pallas as pl
from jax.experimental.pallas import tpu as pltpu


# Only use Mosaic-specific goodies (EUP approx reciprocal, TPU compiler params) when the
# kernels are actually lowered through Mosaic; the CPU/interpret fallback lacks them.
_ON_TPU = jax.default_backend() == "tpu"

_COMPILER_PARAMS = (
    pltpu.CompilerParams(
        dimension_semantics=("parallel", "parallel"),   # shard grid across TCs (v7x)
        vmem_limit_bytes=48 * 1024 * 1024,              # above 16/32 MiB defaults, < 64 MiB (v7x)
    )
    if _ON_TPU
    else None
)


# --------------------------------------------------------------------------
# Kernels
# --------------------------------------------------------------------------
def _embed_pe_kernel(emb_ref, pe_ref, o_ref, *, scale):
    # x = embedding_rows * sqrt(d_model) + pe   (eval-mode dropout == identity)
    # Math stays in the input dtype (bf16 native on v6e/v7x; f32 in this demo).
    o_ref[...] = (emb_ref[...] * scale + pe_ref[...]).astype(o_ref.dtype)


def _ln_proj_kernel(x_ref, alpha_ref, beta_ref, w_ref, b_ref, o_ref, *,
                    eps, use_approx_recip):
    # Final LayerNormalization (torch LayerNormalization: unbiased std, eps on std)
    # fused into the ProjectionLayer matmul epilogue.
    x = x_ref[...].astype(jnp.float32)                      # (tm, D)
    f = x.shape[-1]
    mean = jnp.mean(x, axis=-1, keepdims=True)
    diff = x - mean
    # torch.std() default: unbiased estimator (ddof=1).  (F must be > 1.)
    var = jnp.sum(diff * diff, axis=-1, keepdims=True) * (1.0 / (f - 1))
    denom = jnp.sqrt(var) + eps
    if use_approx_recip:
        inv = pl.reciprocal(denom, approx=True)             # (tm, 1) on the EUP slot
    else:
        inv = 1.0 / denom                                   # interpret / CPU fallback
    xn = diff * inv * alpha_ref[...].astype(jnp.float32) + beta_ref[...].astype(jnp.float32)
    y = jnp.dot(xn, w_ref[...].astype(jnp.float32),
                preferred_element_type=jnp.float32)         # (tm, tn) on the MXU
    o_ref[...] = (y + b_ref[...].astype(jnp.float32)).astype(o_ref.dtype)


# --------------------------------------------------------------------------
# Tiling helpers
# --------------------------------------------------------------------------
def _pick_tile(n, max_tile, unit=8):
    """Largest multiple of `unit` that divides n and is <= max_tile; falls back to n
    (a single full-axis block) when no aligned divisor exists or n already fits."""
    if n <= max_tile:
        return n
    if n % unit != 0:
        return n
    t = max_tile - (max_tile % unit)
    while t >= unit:
        if n % t == 0:
            return t
        t -= unit
    return n


# --------------------------------------------------------------------------
# Wrappers (module-by-module)
# --------------------------------------------------------------------------
def embed_positional(tgt_ids, emb_table, pe, *, dropout_p=0.0, training=False, rng=None):
    """InputEmbeddings + PositionalEncoding: embedding[ids]*sqrt(d_model) + pe, then dropout."""
    b, s = tgt_ids.shape
    _, d = emb_table.shape

    # TODO(synk): data-dependent embedding gather left to XLA; a BlockSpec gather would
    # serialize one (1, d_model) DMA per token, which is slower than XLA's fused gather.
    emb = jnp.take(emb_table, tgt_ids.reshape(-1), axis=0).reshape(b, s, d)

    # Row (sequence) tile: biggest multiple of 8 whose (ts, d) block stays well under VMEM.
    bytes_per_row = d * jnp.dtype(emb.dtype).itemsize
    ts = _pick_tile(s, max_tile=max(8, (4 << 20) // max(bytes_per_row, 1)))

    out = pl.pallas_call(
        functools.partial(_embed_pe_kernel, scale=float(math.sqrt(d))),
        out_shape=jax.ShapeDtypeStruct((b, s, d), emb.dtype),
        grid=(b, s // ts),
        in_specs=[
            pl.BlockSpec((1, ts, d), lambda i, j: (i, j, 0)),
            pl.BlockSpec((ts, d), lambda i, j: (j, 0)),
        ],
        out_specs=pl.BlockSpec((1, ts, d), lambda i, j: (i, j, 0)),
        compiler_params=_COMPILER_PARAMS,
    )(emb, pe)

    if training and dropout_p > 0.0:
        # TODO(synk): fuse dropout into the kernel with pltpu.prng_random_bits on real
        # Mosaic lowering; the hardware PRNG has no interpret/CPU lowering, so the mask
        # is generated in plain JAX here.
        keep = jax.random.bernoulli(rng, 1.0 - dropout_p, out.shape)
        out = jnp.where(keep, out / (1.0 - dropout_p), jnp.zeros_like(out)).astype(out.dtype)
    return out


def layernorm_projection(x, alpha, beta, w_t, b, *, eps=1e-6):
    """ProjectionLayer(LayerNormalization(x)), fused: LN over d_model feeds the matmul."""
    bsz, s, d = x.shape
    m = bsz * s
    n = w_t.shape[1]
    x2 = x.reshape(m, d)
    itemsize = jnp.dtype(jnp.float32).itemsize

    # Size blocks so (x_block + w_block + out_block) * double-buffering stays inside VMEM.
    tm = _pick_tile(m, max_tile=max(8, min(512, (4 << 20) // max(d * itemsize, 1))), unit=8)
    # Lane-dense output: tn is a multiple of 128 when possible (unmasked vst stores).
    tn = _pick_tile(n, max_tile=max(128, min(512, (8 << 20) // max(d * itemsize, 1))), unit=128)

    out = pl.pallas_call(
        functools.partial(_ln_proj_kernel, eps=float(eps), use_approx_recip=_ON_TPU),
        out_shape=jax.ShapeDtypeStruct((m, n), x.dtype),
        grid=(m // tm, n // tn),
        in_specs=[
            pl.BlockSpec((tm, d), lambda i, j: (i, 0)),
            # constant block index -> alpha/beta/w/b are not re-DMA'd when unchanged
            pl.BlockSpec((1, d), lambda i, j: (0, 0)),
            pl.BlockSpec((1, d), lambda i, j: (0, 0)),
            pl.BlockSpec((d, tn), lambda i, j: (0, j)),
            pl.BlockSpec((1, tn), lambda i, j: (0, j)),
        ],
        out_specs=pl.BlockSpec((tm, tn), lambda i, j: (i, j)),
        compiler_params=_COMPILER_PARAMS,
    )(x2, alpha.reshape(1, d), beta.reshape(1, d), w_t, b.reshape(1, n))
    return out.reshape(bsz, s, n)


def gpt_forward(tgt, tgt_mask, params, layers, *, eps=1e-6,
                dropout_p=0.0, training=False, rng=None):
    """GPTModel.forward: tgt_embed -> tgt_pos -> decoder(layers + final LN) -> projection."""
    seq = tgt.shape[1]
    x = embed_positional(tgt, params["embedding"], params["pe"][:seq],
                         dropout_p=dropout_p, training=training, rng=rng)
    # Decoder sub-layers are opaque nn.Modules in the spec (nn.ModuleList contents are
    # not defined); they are applied as user-supplied JAX callables.
    for layer in layers:
        x = layer(x, tgt_mask)
    # Decoder's final LayerNormalization fused into the ProjectionLayer matmul.
    return layernorm_projection(x, params["ln_alpha"], params["ln_bias"],
                                params["proj_w_t"], params["proj_b"], eps=eps)


# --------------------------------------------------------------------------
# Helpers for the demo (PE table, stand-in decoder layers, pure-JAX reference)
# --------------------------------------------------------------------------
def _make_positional_encoding(seq_len, d_model):
    position = jnp.arange(seq_len, dtype=jnp.float32)[:, None]
    div_term = jnp.exp(jnp.arange(0, d_model, 2, dtype=jnp.float32)
                       * (-math.log(10000.0) / d_model))
    pe = jnp.zeros((seq_len, d_model), jnp.float32)
    pe = pe.at[:, 0::2].set(jnp.sin(position * div_term))
    pe = pe.at[:, 1::2].set(jnp.cos(position * div_term))
    return pe


def _make_demo_attention_layer(key, d_model):
    kq, kk, kv = jax.random.split(key, 3)
    sc = 1.0 / math.sqrt(d_model)
    wq = jax.random.normal(kq, (d_model, d_model), jnp.float32) * sc
    wk = jax.random.normal(kk, (d_model, d_model), jnp.float32) * sc
    wv = jax.random.normal(kv, (d_model, d_model), jnp.float32) * sc

    def layer(x, mask):
        q, k, v = x @ wq, x @ wk, x @ wv
        scores = jnp.einsum("bqd,bkd->bqk", q, k) * sc
        scores = jnp.where(mask, scores, -1e9)
        return x + jax.nn.softmax(scores, axis=-1) @ v
    return layer


def _make_demo_mlp_layer(key, d_model):
    k1, k2 = jax.random.split(key)
    w1 = jax.random.normal(k1, (d_model, 4 * d_model), jnp.float32) / math.sqrt(d_model)
    w2 = jax.random.normal(k2, (4 * d_model, d_model), jnp.float32) / math.sqrt(4 * d_model)

    def layer(x, mask):
        del mask
        return x + jnp.maximum(x @ w1, 0.0) @ w2 * 0.1
    return layer


def _reference_forward(tgt, tgt_mask, params, layers, *, eps=1e-6):
    d_model = params["embedding"].shape[1]
    x = params["embedding"][tgt] * math.sqrt(d_model)
    x = x + params["pe"][None, :tgt.shape[1], :]
    for layer in layers:
        x = layer(x, tgt_mask)
    mean = jnp.mean(x, axis=-1, keepdims=True)
    var = jnp.sum((x - mean) ** 2, axis=-1, keepdims=True) / (x.shape[-1] - 1)
    xn = params["ln_alpha"] * (x - mean) / (jnp.sqrt(var) + eps) + params["ln_bias"]
    return xn @ params["proj_w_t"] + params["proj_b"]


# --------------------------------------------------------------------------
if __name__ == "__main__":
    batch, seq, d_model, vocab = 2, 16, 128, 512
    eps = 1e-6

    key = jax.random.PRNGKey(0)
    k_emb, k_ids, k_w, k_b, k_l1, k_l2 = jax.random.split(key, 6)

    params = {
        "embedding": jax.random.normal(k_emb, (vocab, d_model), jnp.float32) * 0.02,
        "pe": _make_positional_encoding(seq, d_model),
        # LayerNormalization init: alpha=ones, bias=zeros (as in the torch module).
        "ln_alpha": jnp.ones((d_model,), jnp.float32),
        "ln_bias": jnp.zeros((d_model,), jnp.float32),
        # nn.Linear weight stored transposed: (d_model, vocab).
        "proj_w_t": jax.random.normal(k_w, (d_model, vocab), jnp.float32) * 0.02,
        "proj_b": jax.random.normal(k_b, (vocab,), jnp.float32) * 0.01,
    }

    tgt = jax.random.randint(k_ids, (batch, seq), 0, vocab, dtype=jnp.int32)
    tgt_mask = jnp.tril(jnp.ones((seq, seq), jnp.bool_))[None]        # causal mask

    layers = [_make_demo_attention_layer(k_l1, d_model),
              _make_demo_mlp_layer(k_l2, d_model)]

    out = gpt_forward(tgt, tgt_mask, params, layers, eps=eps)          # eval mode
    out = jax.block_until_ready(out)
    assert out.shape == (batch, seq, vocab) and out.dtype == jnp.float32

    ref = _reference_forward(tgt, tgt_mask, params, layers, eps=eps)
    max_err = float(jnp.max(jnp.abs(out - ref)))
    assert jnp.allclose(out, ref, atol=2e-2, rtol=2e-2), f"max abs err {max_err}"

    print("KERNEL_OK")
</pallas_src>

<mosaic_0001>
module attributes {stable_mosaic.version = 11 : i64} {
  func.func @_embed_pe_kernel(%arg0: i32, %arg1: i32, %arg2: memref<1x16x128xf32, #tpu.memory_space<vmem>>, %arg3: memref<16x128xf32, #tpu.memory_space<vmem>>, %arg4: memref<1x16x128xf32, #tpu.memory_space<vmem>>) attributes {dimension_semantics = [#tpu.dimension_semantics<arbitrary>, #tpu.dimension_semantics<arbitrary>], iteration_bounds = array<i64: 2, 1>, scalar_prefetch = 0 : i64, scratch_operands = 0 : i64, tpu.core_type = #tpu.core_type<tc>, window_params = [{transform_indices = @transform_0, window_bounds = array<i64: 1, 16, 128>}, {transform_indices = @transform_1, window_bounds = array<i64: 16, 128>}, {transform_indices = @transform_2, window_bounds = array<i64: 1, 16, 128>}]} {
    %c0 = arith.constant 0 : index
    %c0_0 = arith.constant 0 : index
    %c0_1 = arith.constant 0 : index
    %0 = vector.load %arg2[%c0, %c0_0, %c0_1] : memref<1x16x128xf32, #tpu.memory_space<vmem>>, vector<1x16x128xf32>
    %cst = arith.constant 11.3137083 : f32
    %1 = vector.broadcast %cst : f32 to vector<1x16x128xf32>
    %2 = arith.mulf %0, %1 : vector<1x16x128xf32>
    %c0_2 = arith.constant 0 : index
    %c0_3 = arith.constant 0 : index
    %3 = vector.load %arg3[%c0_2, %c0_3] : memref<16x128xf32, #tpu.memory_space<vmem>>, vector<16x128xf32>
    %4 = vector.shape_cast %3 : vector<16x128xf32> to vector<1x16x128xf32>
    %5 = arith.addf %2, %4 : vector<1x16x128xf32>
    %c0_4 = arith.constant 0 : index
    %c0_5 = arith.constant 0 : index
    %c0_6 = arith.constant 0 : index
    %6 = vector.load %arg4[%c0_4, %c0_5, %c0_6] : memref<1x16x128xf32, #tpu.memory_space<vmem>>, vector<1x16x128xf32>
    tpu.vector_store %arg4[%c0_4, %c0_5, %c0_6], %5 {strides = array<i32>} : memref<1x16x128xf32, #tpu.memory_space<vmem>>, vector<1x16x128xf32>,
    return
  }
  func.func @transform_0(%arg0: i32, %arg1: i32) -> (i32, i32, i32) {
    %c0_i32 = arith.constant 0 : i32
    %c0_i32_0 = arith.constant 0 : i32
    return %arg0, %arg1, %c0_i32 : i32, i32, i32
  }
  func.func @transform_1(%arg0: i32, %arg1: i32) -> (i32, i32) {
    %c0_i32 = arith.constant 0 : i32
    %c0_i32_0 = arith.constant 0 : i32
    return %arg1, %c0_i32 : i32, i32
  }
  func.func @transform_2(%arg0: i32, %arg1: i32) -> (i32, i32, i32) {
    %c0_i32 = arith.constant 0 : i32
    %c0_i32_0 = arith.constant 0 : i32
    return %arg0, %arg1, %c0_i32 : i32, i32, i32
  }
}

</mosaic_0001>

<bundles_post_ra>
// kernel: tpu_custom_call.1
= control target key start
LH: loop header
LB: loop body
LE: loop exit
PB: predicated region body
PF: predicated region fallthrough
CT: control target
= control target key end

     0   :  { %7 = vsyncpa [#allocation3], 0  ;;  %s820_s0 = inlined_call_operand.hbm [shape: f32[2,16,128], index: 0, kind: input, shape index: {}]   ;;  %s821_s1 = inlined_call_operand.hbm [shape: f32[16,128], index: 1, kind: input, shape index: {}]   ;;  %s822_s2 = inlined_call_operand.hbm [shape: f32[2,16,128], index: 2, kind: output, shape index: {}]  }
   0x1   :  { %9 = vsyncpa [#allocation3 + $0x1], 0 }
   0x2   :  { %10 = vsyncpa [#allocation6], 0 }
   0x3   :  { %11 = vsyncpa [#allocation4], 0 }
   0x4   :  { %13 = vsyncpa [#allocation4 + $0x1], 0  ;;  %s595_s9 = smov 0   ;;  %s597_s10 = smov 0  }
   0x5   :  { %s599_s11 = smov 0   ;;  %s601_s12 = smov 0  }
   0x6   :  { %s603_s13 = smov 0   ;;  %s605_s14 = smov 0  }
   0x7 LB: > { %s331_s15 = sadd.s32 4294967295, %s571_s14   ;;  %s332_s16 = sadd.s32 4294967294, %s571_s14   ;;  %s571_s14 = sphi %s605_s14, %s19_s14   ;;  %s567_s13 = sphi %s603_s13, %s846_s13   ;;  %s563_s12 = sphi %s601_s12, %s845_s12   ;;  %s559_s11 = sphi %s599_s11, %s844_s11   ;;  %s555_s10 = sphi %s597_s10, %s843_s10   ;;  %s551_s9 = sphi %s595_s9, %s842_s9  }
   0x8   : > { %p53_p0 = scmp.ne.s32.totalorder %s555_s10, %s551_s9  ;;  %p629_p1 = scmp.eq.s32.totalorder %s331_s15, 0 }
   0x9   : > { %p633_p2 = scmp.eq.s32.totalorder %s331_s15, 1  ;;  %p111_p3 = scmp.eq.s32.totalorder %s332_s16, 1 }
   0xa   : > { %s827_s17 = scalar_select %p629_p1, 1, 0 }
   0xb   : > { %s828_s18 = scalar_select %p633_p2, 1, 0 }
   0xc   : > { %p639_p4 = por %p629_p1, %p53_p0  ;;  %p333_p5 = scmp.ge.s32.totalorder %s571_s14, 1 }
   0xd   : > { %p644_p6 = por %p111_p3, %p53_p0  ;;  %p118_p7 = scmp.lt.s32.totalorder %s571_s14, 3 }
   0xe   : > { %s829_s19 = scalar_select %p639_p4, 1, 0 }
   0xf   : > { %s830_s20 = scalar_select %p644_p6, 1, 0 }
  0x10   : > { %p649_p8 = pnand %p333_p5, %p118_p7  ;;  %s573_s22 = smov [#allocation5]  }
  0x11   : > { %s133_s23 = sshll.u32 %s573_s22, 4  ;;  %s31_s25 = sadd.s32 1, %s567_s13  ;;  %s134_s23 = int_to_ptr.vmem [resolvable:$true] %s133_s23 }
  0x12   : > { %s831_s21 = scalar_select %p649_p8, 1, 0 }
  0x13   : > { %p358_p9 = pneg %p649_p8  ;;  %s427_s28 = scalar_lea.hbm %s821_s1, 256 }
  0x14   : > { %p428_p12 = scmp.ne.s32.totalorder %s821_s1, %s427_s28  ;;  %p434_p5 = scmp.lt.u32.totalorder %s427_s28, %s821_s1 }
  0x15   : > { %p658_p11 = pnand %p358_p9, %p629_p1 }
  0x17   : > { %p429_p13 = pneg %p658_p11 }
  0x19   : > { %p430_p0 = pnand %p429_p13, %p428_p12 }
  0x1b   : > { %p431_p3 = pneg %p430_p0 }
  0x1d   : > { %p436_p7 = pnand %p434_p5, %p431_p3 }
  0x1f   : > { %439 = shalt.err (!%p436_p7)
}
  0x20   : > { %s440_s5 = scalar_lea.vmem %s134_s23, 256  ;;  %p448_p1 = scmp.lt.s32.totalorder %s134_s23, %s134_s23 }
  0x21   : > { %p441_p9 = scmp.ne.s32.totalorder %s134_s23, %s440_s5  ;;  %p449_p4 = scmp.lt.s32.totalorder %s440_s5, %s440_s5 }
  0x23   : > { %p443_p10 = pnand %p441_p9, %p429_p13  ;;  %p450_p8 = por %p449_p4, %p448_p1 }
  0x25   : > { %p444_p6 = pneg %p443_p10 }
  0x27   : > { %p451_p2 = pnand %p450_p8, %p444_p6 }
  0x29   : > { %454 = shalt.err (!%p451_p2)
}
  0x2a   : > { %s574_s6 = smov 128   ;;  %s575_s7 = smov 8  }
  0x2b   : > { %361 = dma.hbm_to_vmem [thread:$0]  (!%p658_p11), %s821_s1, 256, %s134_s23, [#allocation6], %s574_s6, %s574_s6, %s575_s7  }
  0x2c   : > { %p33_p1 = scmp.ge.s32.totalorder %s31_s25, 2  ;;  %s40_s16 = sadd.s32 1, %s559_s11 }
  0x2d   : > { %p47_p2 = scmp.ne.s32.totalorder %s559_s11, %s555_s10  ;;  %p48_p4 = scmp.eq.s32.totalorder %s571_s14, 0 }
  0x2e   : > { %s848_s25 = smov (%p33_p1, %s31_s25), 0  ;;  %p834_p8 = scmp.ne.s32.totalorder %s828_s18, 0 }
  0x2f   : > { %p688_p6 = por %p48_p4, %p47_p2  ;;  %s35_s26 = ssub.s32 %s567_s13, %s848_s25 }
  0x30   : > { %p694_p10 = por %p834_p8, %p47_p2  ;;  %p371_p12 = scmp.lt.s32.totalorder %s571_s14, 2 }
  0x31   : > { %p38_p11 = scmp.eq.s32.totalorder %s35_s26, 0  ;;  %s147_s23 = sand.u32 1, %s559_s11  }
  0x32   : > { %s336_s27 = sshll.u32 %s147_s23, 4  ;;  %s348_s29 = sshll.u32 %s567_s13, 8 }
  0x33   : > { %s703_s28 = scalar_select %p38_p11, %s559_s11, %s40_s16  }
  0x34   : > { %s709_s4 = scalar_lea.hbm %s820_s0, %s348_s29  ;;  %s151_s18 = scalar_lea.vmem [#allocation2], %s336_s27 }
  0x35   : > { %s160_s5 = sshll.u32 %s151_s18, 4  ;;  %p715_p13 = pnand %p371_p12, %p688_p6  ;;  %s711_s5 = int_to_ptr.vmem [resolvable:$true] %s160_s5 }
  0x36   : > { %s719_s15 = scalar_lea.sflag [#allocation3], %s147_s23  ;;  %s455_s16 = scalar_lea.hbm %s709_s4, 256 }
  0x37   : > { %p456_p0 = scmp.ne.s32.totalorder %s709_s4, %s455_s16  ;;  %p457_p3 = pneg %p715_p13 }
  0x38   : > { %s460_s22 = scalar_lea.hbm %s820_s0, 512  ;;  %p461_p9 = scmp.lt.u32.totalorder %s709_s4, %s820_s0 }
  0x39   : > { %p458_p5 = pnand %p457_p3, %p456_p0  ;;  %p462_p1 = scmp.lt.u32.totalorder %s460_s22, %s455_s16 }
  0x3a   : > { %p464_p4 = scmp.lt.u32.totalorder %s455_s16, %s709_s4 }
  0x3b   : > { %p459_p7 = pneg %p458_p5  ;;  %p463_p2 = por %p462_p1, %p461_p9 }
  0x3d   : > { %p465_p6 = por %p464_p4, %p463_p2 }
  0x3f   : > { %p466_p8 = pnand %p465_p6, %p459_p7 }
  0x41   : > { %469 = shalt.err (!%p466_p8)
}
  0x42   : > { %s470_s23 = scalar_lea.vmem %s711_s5, 256  ;;  %s576_s3 = smov [#allocation2]  }
  0x43   : > { %p471_p12 = scmp.ne.s32.totalorder %s711_s5, %s470_s23  ;;  %s475_s18 = sshll.u32 %s576_s3, 4  ;;  %s476_s18 = int_to_ptr.vmem [resolvable:$false] %s475_s18 }
  0x44   : > { %s477_s26 = scalar_lea.vmem %s476_s18, 512  ;;  %p478_p5 = scmp.lt.s32.totalorder %s711_s5, %s476_s18 }
  0x45   : > { %p473_p11 = pnand %p471_p12, %p457_p3  ;;  %p479_p9 = scmp.lt.s32.totalorder %s477_s26, %s470_s23 }
  0x47   : > { %p474_p0 = pneg %p473_p11  ;;  %p480_p1 = por %p479_p9, %p478_p5 }
  0x49   : > { %p481_p2 = pnand %p480_p1, %p474_p0 }
  0x4b   : > { %484 = shalt.err (!%p481_p2)
}
  0x4c   : > { %365 = dma.hbm_to_vmem [thread:$0]  (!%p715_p13), %s709_s4, 256, %s711_s5, %s719_s15, %s574_s6, %s574_s6, %s575_s7  }
  0x4d   : > { %p837_p3 = scmp.ne.s32.totalorder %s831_s21, 0 }
  0x4e   : > { %s753_s16 = sand.u32 (!%p837_p3), 1, %s555_s10   ;;  %p838_p7 = scmp.ne.s32.totalorder (!%p837_p3), %s829_s19, 0 }
  0x4f   : > { %172 = sbr.rel (%p837_p3) target bundleno = 116 (0x74), region = 28  ;;  %s340_s27 = sshll.u32 (!%p837_p3), %s753_s16, 4 }
  0x50   : > { %s175_s22 = scalar_lea.sflag (!%p837_p3), [#allocation3], %s753_s16  ;;  %s178_s29 = scalar_lea.vmem (!%p837_p3), [#allocation2], %s340_s27 }
  0x56   : > { %538 = dma.done.wait (%p838_p7), %s175_s22, 256  }
  0x57   : > { %540 = vsyncadd (%p838_p7), %s175_s22, 4294967040  ;;  %p839_p4 = scmp.ne.s32.totalorder %s827_s17, 0 }
  0x59   : > { %542 = dma.done.wait (%p839_p4), [#allocation6], 256  }
  0x5a   : > { %544 = vsyncadd (%p839_p4), [#allocation6], 4294967040  ;;  %s202_s21 = scalar_lea.vmem [#allocation7], %s340_s27  ;;  %s349_s7 = sshll.u32 %s563_s12, 8  ;;  %v206_v0 = vld [vmem:[%s178_s29] sm:$0xff]  ;;  %v207_v2 = vld [vmem:[%s178_s29 + $0x8] sm:$0xff] }
  0x5b   : > { %s232_s6 = sshll.u32 %s202_s21, 4  ;;  %v210_v1 = vld [vmem:[#allocation5] sm:$0xff]  ;;  %v208_v3 = vmul.f32 11.313708, %v206_v0  ;;  %v209_v4 = vmul.f32 11.313708, %v207_v2  ;;  %s771_s17 = scalar_lea.hbm %s822_s2, %s349_s7  ;;  %s766_s6 = int_to_ptr.vmem [resolvable:$true] %s232_s6 }
  0x5c   : > { %v211_v5 = vld [vmem:[#allocation5 + $0x8] sm:$0xff]  ;;  %s217_s12 = scalar_lea.sflag [#allocation4], %s753_s16  ;;  %s485_s5 = scalar_lea.vmem %s766_s6, 256 }
  0x5d   : > { %v212_v6 = vadd.f32 %v210_v1, %v208_v3  ;;  %v213_v7 = vadd.f32 %v211_v5, %v209_v4  ;;  %p486_p13 = scmp.ne.s32.totalorder %s766_s6, %s485_s5  ;;  %s577_s8 = smov [#allocation7]  }
  0x5e   : > { %s489_s15 = sshll.u32 %s577_s8, 4  ;;  %s490_s15 = int_to_ptr.vmem [resolvable:$false] %s489_s15 }
  0x5f   : > { %214 = vst [vmem:[%s202_s21] sm:$0xff] %v212_v6  ;;  %215 = vst [vmem:[%s202_s21 + $0x8] sm:$0xff] %v213_v7  ;;  %p487_p6 = pnand %p486_p13, %p694_p10  ;;  %s491_s30 = scalar_lea.vmem %s490_s15, 512 }
  0x60   : > { %p492_p12 = scmp.lt.s32.totalorder %s766_s6, %s490_s15  ;;  %p493_p11 = scmp.lt.s32.totalorder %s491_s30, %s485_s5 }
  0x61   : > { %p488_p8 = pneg %p487_p6 }
  0x62   : > { %p494_p0 = por %p493_p11, %p492_p12 }
  0x64   : > { %p495_p5 = pnand %p494_p0, %p488_p8 }
  0x66   : > { %498 = shalt.err (!%p495_p5)
}
  0x67   : > { %s499_s23 = scalar_lea.hbm %s771_s17, 256  ;;  %s503_s26 = scalar_lea.hbm %s822_s2, 512 }
  0x68   : > { %p500_p9 = scmp.ne.s32.totalorder %s771_s17, %s499_s23  ;;  %p504_p3 = scmp.lt.u32.totalorder %s771_s17, %s822_s2 }
  0x69   : > { %p505_p7 = scmp.lt.u32.totalorder %s503_s26, %s499_s23  ;;  %p507_p13 = scmp.lt.u32.totalorder %s499_s23, %s771_s17 }
  0x6a   : > { %p501_p1 = pnand %p500_p9, %p694_p10 }
  0x6b   : > { %p506_p4 = por %p505_p7, %p504_p3 }
  0x6c   : > { %p502_p2 = pneg %p501_p1 }
  0x6d   : > { %p508_p6 = por %p507_p13, %p506_p4 }
  0x6f   : > { %p509_p8 = pnand %p508_p6, %p502_p2 }
  0x71   : > { %512 = shalt.err (!%p509_p8)
}
  0x72   : > { %s578_s29 = smov 128   ;;  %s579_s21 = smov 8  }
  0x73   : > { %356 = dma.vmem_to_hbm [thread:$0]  (%p694_p10), %s766_s6, 256, %s771_s17, %s217_s12, %s578_s29, %s578_s29, %s579_s21  }
  0x74 PF: > { %s247_s7 = sand.u32 1, %s551_s9   ;;  %p840_p12 = scmp.ne.s32.totalorder %s830_s20, 0 }
  0x75   : > { %p841_p11 = scmp.ge.s32.totalorder %s571_s14, 2  ;;  %s248_s19 = scalar_lea.sflag [#allocation4], %s247_s7 }
  0x77   : > { %p367_p0 = pnand %p841_p11, %p840_p12 }
  0x79   : > { %546 = dma.done.wait (!%p367_p0), %s248_s19, 256  }
  0x7a   : > { %548 = vsyncadd (!%p367_p0), %s248_s19, 4294967040  ;;  %s19_s14 = sadd.s32 1, %s571_s14   ;;  %s842_s9 = smov %s555_s10 }
  0x7b   : > { %p16_p5 = scmp.ge.s32.totalorder %s19_s14, 4   ;;  %s843_s10 = smov %s559_s11 }
  0x7c   : > { %s844_s11 = smov %s703_s28  ;;  %s845_s12 = smov %s567_s13 }
  0x7d   : > { %s846_s13 = smov %s848_s25  ;;  %18 = sbr.rel (!%p16_p5) target bundleno = 7 (0x7), region = 78 }
  0x84   :  { %253 = vsyncpa [#allocation3], 1 }
  0x85   :  { %255 = vsyncpa [#allocation3 + $0x1], 1 }
  0x86   :  { %256 = vsyncpa [#allocation6], 1 }
  0x87   :  { %257 = vsyncpa [#allocation4], 1 }
  0x88   :  { %259 = vsyncpa [#allocation4 + $0x1], 1 }

</bundles_post_ra>
